<compile_context>
chip_gen: v6e
topology: v6e:2x2x1
jax: 0.10.0
libtpu: 0.0.40
codegen_flags: <defaults>
</compile_context>

<pallas_src>
import jax
import jax.numpy as jnp
from jax.experimental import pallas as pl
from jax.experimental.pallas import tpu as pltpu


_LANE = 128
# ~1 MiB per f32 block (~0.5 MiB bf16): large enough to approach the HBM
# roofline, small enough that double-buffered in+out tiles stay well inside
# the scoped-VMEM budget on all of v5e / v6e / v7x.
_TARGET_BLOCK_ELEMS = 256 * 1024


def _round_up(x, m):
    return ((x + m - 1) // m) * m


def _choose_layout(n):
    """Pick a lane-dense column count (multiple of 128) and padded length."""
    # Prefer a divisor of n so no padding copy is needed; widest first so the
    # output last dim is as lane-dense as possible.
    for cols in (2048, 1024, 512, 256, 128):
        if n % cols == 0:
            return cols, n
    # Odd sizes: pad the flat vector up to a multiple of 128 lanes.
    cols = _LANE
    return cols, _round_up(n, cols)


def _heatedup_kernel(factor_ref, x_ref, o_ref):
    # factor_ref: (1,) float32 scalar in SMEM.
    # x_ref / o_ref: (tile_rows, cols) VMEM tiles.
    f = factor_ref[0]
    o_ref[...] = (f * x_ref[...].astype(jnp.float32)).astype(o_ref.dtype)


@jax.jit
def _heated_up_scale_jit(x, factor_f32):
    orig_shape = x.shape
    n = x.size

    cols, n_pad = _choose_layout(n)
    x_flat = x.reshape(-1)
    if n_pad != n:
        # One-time pad for odd sizes so the last dim stays a full multiple of
        # 128 lanes (unmasked stores); sliced off again below.
        x_flat = jnp.pad(x_flat, (0, n_pad - n))

    rows = n_pad // cols
    # Row tile: multiple of 16 (bf16 packs 16 rows per vreg) when tiling;
    # if the whole array fits in one block, the full-dimension exception to
    # the (8, 128) rule applies.
    tile_rows_full = max(16, (_TARGET_BLOCK_ELEMS // cols) // 16 * 16)
    tile_rows = min(rows, tile_rows_full)
    grid_r = pl.cdiv(rows, tile_rows)

    x2d = x_flat.reshape(rows, cols)

    out2d = pl.pallas_call(
        _heatedup_kernel,
        out_shape=jax.ShapeDtypeStruct((rows, cols), x.dtype),
        grid_spec=pltpu.PrefetchScalarGridSpec(
            num_scalar_prefetch=0,
            grid=(grid_r,),
            in_specs=[
                pl.BlockSpec(memory_space=pltpu.SMEM),           # factor (1,) f32
                pl.BlockSpec((tile_rows, cols), lambda i: (i, 0)),  # input row tile
            ],
            out_specs=pl.BlockSpec((tile_rows, cols), lambda i: (i, 0)),
        ),
        compiler_params=pltpu.CompilerParams(
            dimension_semantics=("parallel",),   # elementwise: shard tiles across TCs
            vmem_limit_bytes=32 * 1024 * 1024,   # portable budget incl. v7x (64 MiB phys)
        ),
    )(factor_f32, x2d)

    out_flat = out2d.reshape(-1)
    if n_pad != n:
        out_flat = out_flat[:n]
    return out_flat.reshape(orig_shape)


def heated_up_scale(x, factor):
    """Scale every element of `x` (any shape/dtype) by the Python scalar `factor`."""
    factor_arr = jnp.asarray([factor], dtype=jnp.float32)  # traced: no retrace per factor
    return _heated_up_scale_jit(x, factor_arr)


class HeatedUpScalar:
    """JAX/Pallas port of inclearn's HeatedUpScalar post-processor."""

    def __init__(self, first_value, last_value, nb_steps, scope="task", **kwargs):
        self.scope = scope
        self.first_value = first_value
        self.step = (max(first_value, last_value) - min(first_value, last_value)) / (
            nb_steps - 1
        )
        self._factor = -1 if first_value > last_value else 1
        self._increment = 0

    def on_task_end(self):
        if self.scope == "task":
            self._increment += 1

    def on_epoch_end(self):
        if self.scope == "epoch":
            self._increment += 1

    @property
    def factor(self):
        return self.first_value + self._factor * self._increment * self.step

    def __call__(self, inputs):
        return heated_up_scale(inputs, self.factor)


if __name__ == "__main__":
    # Deterministic module hyperparameters (the module has no tensor params —
    # it's a stateless scalar post-processor).
    module = HeatedUpScalar(first_value=16.0, last_value=4.0, nb_steps=5)
    module.on_task_end()  # advance one task so factor != first_value (factor = 13.0)

    key = jax.random.PRNGKey(0)
    k1, k2 = jax.random.split(key)

    # Main NCHW example (hits the zero-pad-free, exactly-divisible path).
    x = jax.random.normal(k1, (2, 4, 16, 16), dtype=jnp.float32)
    out = jax.block_until_ready(module(x))
    ref = jnp.float32(module.factor) * x
    assert out.shape == x.shape and out.dtype == x.dtype
    assert jnp.allclose(out, ref, rtol=1e-6, atol=1e-6)

    # Odd-shaped example (exercises the pad-to-128-lanes fallback path).
    x_odd = jax.random.normal(k2, (3, 5, 7), dtype=jnp.float32)
    out_odd = jax.block_until_ready(module(x_odd))
    ref_odd = jnp.float32(module.factor) * x_odd
    assert out_odd.shape == x_odd.shape and out_odd.dtype == x_odd.dtype
    assert jnp.allclose(out_odd, ref_odd, rtol=1e-6, atol=1e-6)

    print("KERNEL_OK")
</pallas_src>

<mosaic_0001>
module attributes {stable_mosaic.version = 11 : i64} {
  func.func @_heatedup_kernel(%arg0: i32, %arg1: memref<1xf32, #tpu.memory_space<smem>>, %arg2: memref<1x2048xf32, #tpu.memory_space<vmem>>, %arg3: memref<1x2048xf32, #tpu.memory_space<vmem>>) attributes {dimension_semantics = [#tpu.dimension_semantics<parallel>], iteration_bounds = array<i64: 1>, scalar_prefetch = 0 : i64, scratch_operands = 0 : i64, tpu.core_type = #tpu.core_type<tc>, window_params = [{transform_indices = @transform_0, window_bounds = array<i64: 1>}, {transform_indices = @transform_1, window_bounds = array<i64: 1, 2048>}, {transform_indices = @transform_2, window_bounds = array<i64: 1, 2048>}]} {
    %c0 = arith.constant 0 : index
    %0 = memref.load %arg1[%c0] : memref<1xf32, #tpu.memory_space<smem>>
    %c0_0 = arith.constant 0 : index
    %c0_1 = arith.constant 0 : index
    %1 = vector.load %arg2[%c0_0, %c0_1] : memref<1x2048xf32, #tpu.memory_space<vmem>>, vector<1x2048xf32>
    %2 = vector.broadcast %0 : f32 to vector<1x2048xf32>
    %3 = arith.mulf %2, %1 : vector<1x2048xf32>
    %c0_2 = arith.constant 0 : index
    %c0_3 = arith.constant 0 : index
    %4 = vector.load %arg3[%c0_2, %c0_3] : memref<1x2048xf32, #tpu.memory_space<vmem>>, vector<1x2048xf32>
    tpu.vector_store %arg3[%c0_2, %c0_3], %3 {strides = array<i32>} : memref<1x2048xf32, #tpu.memory_space<vmem>>, vector<1x2048xf32>,
    return
  }
  func.func @transform_0(%arg0: i32) -> i32 {
    %c0_i32 = arith.constant 0 : i32
    %c0_i32_0 = arith.constant 0 : i32
    return %c0_i32 : i32
  }
  func.func @transform_1(%arg0: i32) -> (i32, i32) {
    %c0_i32 = arith.constant 0 : i32
    %c0_i32_0 = arith.constant 0 : i32
    return %arg0, %c0_i32 : i32, i32
  }
  func.func @transform_2(%arg0: i32) -> (i32, i32) {
    %c0_i32 = arith.constant 0 : i32
    %c0_i32_0 = arith.constant 0 : i32
    return %arg0, %c0_i32 : i32, i32
  }
}

</mosaic_0001>

<bundles_post_ra>
// kernel: _heated_up_scale_jit.1
= control target key start
LH: loop header
LB: loop body
LE: loop exit
PB: predicated region body
PF: predicated region fallthrough
CT: control target
= control target key end

     0   :  { %s54_s0 = inlined_call_operand.<no memory space> [shape: f32[1], index: 0, kind: input, shape index: {}]   ;;  %s55_s1 = inlined_call_operand.vmem [shape: f32[1,2048], index: 1, kind: input, shape index: {}]   ;;  %s56_s2 = inlined_call_operand.vmem [shape: f32[1,2048], index: 2, kind: output, shape index: {}]  }
   0x1   :  { %v13_v0 = vld [vmem:[%s55_s1] sm:$0xff]  ;;  %v15_v1 = vstv %s54_s0  ;;  %v14_v2 = vld [vmem:[%s55_s1 + $0x8] sm:$0xff] }
   0x2   :  { %v16_v3 = vmul.f32 %v15_v1, %v13_v0  ;;  %v17_v4 = vmul.f32 %v15_v1, %v14_v2 }
   0x4   :  { %18 = vst [vmem:[%s56_s2] sm:$0xff] %v16_v3  ;;  %19 = vst [vmem:[%s56_s2 + $0x8] sm:$0xff] %v17_v4 }

</bundles_post_ra>
